<compile_context>
chip_gen: v7x
topology: tpu7x:2x2x1
jax: 0.10.0
libtpu: 0.0.40
codegen_flags: <defaults>
</compile_context>

<pallas_src>
import functools

import jax
import jax.numpy as jnp
from jax.experimental import pallas as pl
from jax.experimental.pallas import tpu as pltpu


def mlp_kernel(x_ref, w1_ref, b1_ref, w2_ref, b2_ref, w3_ref, b3_ref, o_ref):
    # In-kernel bf16 cast of the streamed f32 x tile (hidden under MXU cadence).
    x = x_ref[...].astype(jnp.bfloat16)

    h1 = jnp.dot(x, w1_ref[...], preferred_element_type=jnp.float32) + b1_ref[...]
    h1 = jnp.maximum(h1, 0.0)

    h2 = jnp.dot(h1.astype(jnp.bfloat16), w2_ref[...],
                 preferred_element_type=jnp.float32) + b2_ref[...]
    h2 = jnp.maximum(h2, 0.0)

    # Layer-3 weights are zero-padded to 128 output columns; the padded bias
    # columns are a huge negative, so exp()==0 there and the 128-wide softmax
    # is exact for the real columns while the store stays lane-dense.
    logits = jnp.dot(h2.astype(jnp.bfloat16), w3_ref[...],
                     preferred_element_type=jnp.float32) + b3_ref[...]

    m = jnp.max(logits, axis=-1, keepdims=True)
    e = jnp.exp(logits - m)
    s = jnp.sum(e, axis=-1, keepdims=True)
    inv = pl.reciprocal(s, approx=True)          # EUP slot
    inv = inv * (2.0 - s * inv)                  # one Newton step: ~exact normalization
    # Partial last batch tile: rows past B hold garbage but rows are
    # independent and their stores are masked by Pallas -> no contamination.
    o_ref[...] = e * inv


def prepare_params(params, out_pad=128):
    """One-time (outside the hot path) bf16 cast + lane-dense padding of layer 3."""
    w1, b1, w2, b2, w3, b3 = params
    H, out_dim = w3.shape
    w1b = w1.astype(jnp.bfloat16)
    w2b = w2.astype(jnp.bfloat16)
    w3b = jnp.zeros((H, out_pad), jnp.bfloat16).at[:, :out_dim].set(
        w3.astype(jnp.bfloat16))
    b3p = jnp.full((1, out_pad), -1e30, jnp.float32).at[:, :out_dim].set(
        b3.reshape(1, -1))
    return (w1b, b1.reshape(1, -1), w2b, b2.reshape(1, -1), w3b, b3p), int(out_dim)


def _pick_tile(B, block_b):
    # Batch tile: multiple-of-16 tile (bf16 sublane packing) when tiling; for
    # mid-size single-tile batches split into 2 steps so both v7x TCs get work.
    if B > block_b:
        return block_b
    if B >= 512:
        half = (B + 1) // 2
        return ((half + 15) // 16) * 16
    return B


@functools.partial(jax.jit, static_argnames=("out_dim", "block_b"))
def mlp_forward(x, prepared, *, out_dim=3, block_b=2048):
    w1b, b1, w2b, b2, w3b, b3p = prepared
    B, D_in = x.shape
    H = w1b.shape[1]
    out_pad = w3b.shape[1]

    TB = _pick_tile(B, block_b)
    grid = (pl.cdiv(B, TB),)

    # VMEM budget (lane-padded, double-buffered I/O + compiler intermediates):
    # at TB=2048, D_in<=1024 this stays well under the 48 MiB limit below and
    # leaves headroom on v7x's 64 MiB physical VMEM.
    resident = lambda shape: pl.BlockSpec(shape, lambda i: (0,) * len(shape))

    cost = pl.CostEstimate(
        flops=2 * B * (D_in * H + H * H + H * out_pad),
        transcendentals=B * out_pad,
        bytes_accessed=(B * D_in * 4 + B * out_pad * 4
                        + sum(int(a.size) * a.dtype.itemsize
                              for a in (w1b, b1, w2b, b2, w3b, b3p))),
    )

    out_padded = pl.pallas_call(
        mlp_kernel,
        out_shape=jax.ShapeDtypeStruct((B, out_pad), jnp.float32),
        grid=grid,
        in_specs=[
            pl.BlockSpec((TB, D_in), lambda i: (i, 0)),       # x tile, streamed
            resident(w1b.shape), resident(b1.shape),           # weights stay in VMEM
            resident(w2b.shape), resident(b2.shape),
            resident(w3b.shape), resident(b3p.shape),
        ],
        out_specs=pl.BlockSpec((TB, out_pad), lambda i: (i, 0)),  # lane-dense store
        compiler_params=pltpu.CompilerParams(
            dimension_semantics=("parallel",),
            vmem_limit_bytes=48 * 1024 * 1024),
        cost_estimate=cost,
    )(x, w1b, b1, w2b, b2, w3b, b3p)

    return out_padded[:, :out_dim]


def init_params(key, input_dim, hidden=50, out=3):
    # Deterministic init mimicking nn.Linear's uniform(-1/sqrt(fan_in), 1/sqrt(fan_in)).
    keys = jax.random.split(key, 6)

    def linear(kw, kb, fan_in, fan_out):
        bound = 1.0 / jnp.sqrt(fan_in)
        w = jax.random.uniform(kw, (fan_in, fan_out), jnp.float32, -bound, bound)
        b = jax.random.uniform(kb, (1, fan_out), jnp.float32, -bound, bound)
        return w, b

    w1, b1 = linear(keys[0], keys[1], input_dim, hidden)
    w2, b2 = linear(keys[2], keys[3], hidden, hidden)
    w3, b3 = linear(keys[4], keys[5], hidden, out)
    return (w1, b1, w2, b2, w3, b3)


def mlp_reference_bf16(x, params):
    # Reference with the same bf16 MXU operands (tight comparison target).
    w1, b1, w2, b2, w3, b3 = params
    xb = x.astype(jnp.bfloat16)
    w1b, w2b, w3b = (w.astype(jnp.bfloat16) for w in (w1, w2, w3))
    h1 = jax.nn.relu(jnp.dot(xb, w1b, preferred_element_type=jnp.float32) + b1)
    h2 = jax.nn.relu(jnp.dot(h1.astype(jnp.bfloat16), w2b,
                             preferred_element_type=jnp.float32) + b2)
    logits = jnp.dot(h2.astype(jnp.bfloat16), w3b,
                     preferred_element_type=jnp.float32) + b3
    return jax.nn.softmax(logits, axis=1)


def mlp_reference_f32(x, params):
    # Pure f32 reference matching the PyTorch module exactly (loose comparison).
    w1, b1, w2, b2, w3, b3 = params
    h1 = jax.nn.relu(x @ w1 + b1)
    h2 = jax.nn.relu(h1 @ w2 + b2)
    return jax.nn.softmax(h2 @ w3 + b3, axis=1)


if __name__ == "__main__":
    key = jax.random.PRNGKey(0)
    k_x, k_p = jax.random.split(key)

    B, input_dim = 8, 32
    x = jax.random.normal(k_x, (B, input_dim), jnp.float32)
    params = init_params(k_p, input_dim)
    prepared, out_dim = prepare_params(params)

    out = mlp_forward(x, prepared, out_dim=out_dim)
    jax.block_until_ready(out)

    assert out.shape == (B, 3)

    # Tight check vs. a reference using the same bf16 operands + f32 accumulate.
    ref_bf16 = mlp_reference_bf16(x, params)
    assert jnp.allclose(out, ref_bf16, atol=5e-3, rtol=5e-3)

    # Loose check vs. the exact f32 module semantics.
    ref_f32 = mlp_reference_f32(x, params)
    assert jnp.allclose(out, ref_f32, atol=3e-2, rtol=3e-2)

    # Softmax rows sum to ~1 (Newton-refined reciprocal -> near-exact).
    assert jnp.allclose(jnp.sum(out, axis=1), jnp.ones((B,)), atol=1e-3)

    print("KERNEL_OK")
</pallas_src>

<mosaic_0001>
module attributes {stable_mosaic.version = 11 : i64} {
  func.func @mlp_kernel(%arg0: i32, %arg1: memref<8x32xf32, #tpu.memory_space<vmem>>, %arg2: memref<32x50xbf16, #tpu.memory_space<vmem>>, %arg3: memref<1x50xf32, #tpu.memory_space<vmem>>, %arg4: memref<50x50xbf16, #tpu.memory_space<vmem>>, %arg5: memref<1x50xf32, #tpu.memory_space<vmem>>, %arg6: memref<50x128xbf16, #tpu.memory_space<vmem>>, %arg7: memref<1x128xf32, #tpu.memory_space<vmem>>, %arg8: memref<8x128xf32, #tpu.memory_space<vmem>>) attributes {dimension_semantics = [#tpu.dimension_semantics<parallel>], iteration_bounds = array<i64: 1>, scalar_prefetch = 0 : i64, scratch_operands = 0 : i64, tpu.core_type = #tpu.core_type<tc>, window_params = [{transform_indices = @transform_0, window_bounds = array<i64: 8, 32>}, {pipeline_mode = #tpu.pipeline_mode<synchronous>, transform_indices = @transform_1, window_bounds = array<i64: 32, 50>}, {pipeline_mode = #tpu.pipeline_mode<synchronous>, transform_indices = @transform_2, window_bounds = array<i64: 1, 50>}, {pipeline_mode = #tpu.pipeline_mode<synchronous>, transform_indices = @transform_3, window_bounds = array<i64: 50, 50>}, {pipeline_mode = #tpu.pipeline_mode<synchronous>, transform_indices = @transform_4, window_bounds = array<i64: 1, 50>}, {pipeline_mode = #tpu.pipeline_mode<synchronous>, transform_indices = @transform_5, window_bounds = array<i64: 50, 128>}, {pipeline_mode = #tpu.pipeline_mode<synchronous>, transform_indices = @transform_6, window_bounds = array<i64: 1, 128>}, {transform_indices = @transform_7, window_bounds = array<i64: 8, 128>}]} {
    %c0 = arith.constant 0 : index
    %c0_0 = arith.constant 0 : index
    %0 = vector.load %arg1[%c0, %c0_0] : memref<8x32xf32, #tpu.memory_space<vmem>>, vector<8x32xf32>
    %1 = arith.truncf %0 : vector<8x32xf32> to vector<8x32xbf16>
    %c0_1 = arith.constant 0 : index
    %c0_2 = arith.constant 0 : index
    %2 = vector.load %arg2[%c0_1, %c0_2] : memref<32x50xbf16, #tpu.memory_space<vmem>>, vector<32x50xbf16>
    %cst = arith.constant dense<0.000000e+00> : vector<8x50xf32>
    %3 = tpu.matmul %1, %2, %cst {dimension_numbers = #tpu.dot_dimension_numbers<[1], [0], [0], [1], [0, 0, 1, 1], [], []>} : vector<8x32xbf16>, vector<32x50xbf16>, vector<8x50xf32> -> vector<8x50xf32>
    %c0_3 = arith.constant 0 : index
    %c0_4 = arith.constant 0 : index
    %4 = vector.load %arg3[%c0_3, %c0_4] : memref<1x50xf32, #tpu.memory_space<vmem>>, vector<1x50xf32>
    %5 = vector.broadcast %4 : vector<1x50xf32> to vector<8x50xf32>
    %6 = arith.addf %3, %5 : vector<8x50xf32>
    %cst_5 = arith.constant 0.000000e+00 : f32
    %7 = vector.broadcast %cst_5 : f32 to vector<8x50xf32>
    %8 = arith.maximumf %6, %7 : vector<8x50xf32>
    %9 = arith.truncf %8 : vector<8x50xf32> to vector<8x50xbf16>
    %c0_6 = arith.constant 0 : index
    %c0_7 = arith.constant 0 : index
    %10 = vector.load %arg4[%c0_6, %c0_7] : memref<50x50xbf16, #tpu.memory_space<vmem>>, vector<50x50xbf16>
    %cst_8 = arith.constant dense<0.000000e+00> : vector<8x50xf32>
    %11 = tpu.matmul %9, %10, %cst_8 {dimension_numbers = #tpu.dot_dimension_numbers<[1], [0], [0], [1], [0, 0, 1, 1], [], []>} : vector<8x50xbf16>, vector<50x50xbf16>, vector<8x50xf32> -> vector<8x50xf32>
    %c0_9 = arith.constant 0 : index
    %c0_10 = arith.constant 0 : index
    %12 = vector.load %arg5[%c0_9, %c0_10] : memref<1x50xf32, #tpu.memory_space<vmem>>, vector<1x50xf32>
    %13 = vector.broadcast %12 : vector<1x50xf32> to vector<8x50xf32>
    %14 = arith.addf %11, %13 : vector<8x50xf32>
    %cst_11 = arith.constant 0.000000e+00 : f32
    %15 = vector.broadcast %cst_11 : f32 to vector<8x50xf32>
    %16 = arith.maximumf %14, %15 : vector<8x50xf32>
    %17 = arith.truncf %16 : vector<8x50xf32> to vector<8x50xbf16>
    %c0_12 = arith.constant 0 : index
    %c0_13 = arith.constant 0 : index
    %18 = vector.load %arg6[%c0_12, %c0_13] : memref<50x128xbf16, #tpu.memory_space<vmem>>, vector<50x128xbf16>
    %cst_14 = arith.constant dense<0.000000e+00> : vector<8x128xf32>
    %19 = tpu.matmul %17, %18, %cst_14 {dimension_numbers = #tpu.dot_dimension_numbers<[1], [0], [0], [1], [0, 0, 1, 1], [], []>} : vector<8x50xbf16>, vector<50x128xbf16>, vector<8x128xf32> -> vector<8x128xf32>
    %c0_15 = arith.constant 0 : index
    %c0_16 = arith.constant 0 : index
    %20 = vector.load %arg7[%c0_15, %c0_16] : memref<1x128xf32, #tpu.memory_space<vmem>>, vector<1x128xf32>
    %21 = vector.broadcast %20 : vector<1x128xf32> to vector<8x128xf32>
    %22 = arith.addf %19, %21 : vector<8x128xf32>
    %cst_17 = arith.constant dense<0xFF800000> : vector<8xf32>
    %23 = vector.multi_reduction <maximumf>, %22, %cst_17 [1] : vector<8x128xf32> to vector<8xf32>
    %24 = vector.shape_cast %23 : vector<8xf32> to vector<8x1xf32>
    %25 = vector.broadcast %24 : vector<8x1xf32> to vector<8x128xf32>
    %26 = arith.subf %22, %25 : vector<8x128xf32>
    %27 = math.exp %26 : vector<8x128xf32>
    %cst_18 = arith.constant dense<0.000000e+00> : vector<8xf32>
    %28 = vector.multi_reduction <add>, %27, %cst_18 [1] : vector<8x128xf32> to vector<8xf32>
    %29 = vector.shape_cast %28 : vector<8xf32> to vector<8x1xf32>
    %30 = tpu.reciprocal %29 {approx = true} : vector<8x1xf32> -> vector<8x1xf32>
    %31 = arith.mulf %29, %30 : vector<8x1xf32>
    %cst_19 = arith.constant 2.000000e+00 : f32
    %32 = vector.broadcast %cst_19 : f32 to vector<8x1xf32>
    %33 = arith.subf %32, %31 : vector<8x1xf32>
    %34 = arith.mulf %30, %33 : vector<8x1xf32>
    %35 = vector.broadcast %34 : vector<8x1xf32> to vector<8x128xf32>
    %36 = arith.mulf %27, %35 : vector<8x128xf32>
    %c0_20 = arith.constant 0 : index
    %c0_21 = arith.constant 0 : index
    %37 = vector.load %arg8[%c0_20, %c0_21] : memref<8x128xf32, #tpu.memory_space<vmem>>, vector<8x128xf32>
    tpu.vector_store %arg8[%c0_20, %c0_21], %36 {strides = array<i32>} : memref<8x128xf32, #tpu.memory_space<vmem>>, vector<8x128xf32>,
    return
  }
  func.func @transform_0(%arg0: i32) -> (i32, i32) {
    %c0_i32 = arith.constant 0 : i32
    %c0_i32_0 = arith.constant 0 : i32
    return %arg0, %c0_i32 : i32, i32
  }
  func.func @transform_1(%arg0: i32) -> (i32, i32) {
    %c0_i32 = arith.constant 0 : i32
    %c0_i32_0 = arith.constant 0 : i32
    %c0_i32_1 = arith.constant 0 : i32
    return %c0_i32, %c0_i32_0 : i32, i32
  }
  func.func @transform_2(%arg0: i32) -> (i32, i32) {
    %c0_i32 = arith.constant 0 : i32
    %c0_i32_0 = arith.constant 0 : i32
    %c0_i32_1 = arith.constant 0 : i32
    return %c0_i32, %c0_i32_0 : i32, i32
  }
  func.func @transform_3(%arg0: i32) -> (i32, i32) {
    %c0_i32 = arith.constant 0 : i32
    %c0_i32_0 = arith.constant 0 : i32
    %c0_i32_1 = arith.constant 0 : i32
    return %c0_i32, %c0_i32_0 : i32, i32
  }
  func.func @transform_4(%arg0: i32) -> (i32, i32) {
    %c0_i32 = arith.constant 0 : i32
    %c0_i32_0 = arith.constant 0 : i32
    %c0_i32_1 = arith.constant 0 : i32
    return %c0_i32, %c0_i32_0 : i32, i32
  }
  func.func @transform_5(%arg0: i32) -> (i32, i32) {
    %c0_i32 = arith.constant 0 : i32
    %c0_i32_0 = arith.constant 0 : i32
    %c0_i32_1 = arith.constant 0 : i32
    return %c0_i32, %c0_i32_0 : i32, i32
  }
  func.func @transform_6(%arg0: i32) -> (i32, i32) {
    %c0_i32 = arith.constant 0 : i32
    %c0_i32_0 = arith.constant 0 : i32
    %c0_i32_1 = arith.constant 0 : i32
    return %c0_i32, %c0_i32_0 : i32, i32
  }
  func.func @transform_7(%arg0: i32) -> (i32, i32) {
    %c0_i32 = arith.constant 0 : i32
    %c0_i32_0 = arith.constant 0 : i32
    return %arg0, %c0_i32 : i32, i32
  }
}

</mosaic_0001>

<bundles_post_ra>
// kernel: mlp_forward.1
= control target key start
LH: loop header
LB: loop body
LE: loop exit
PB: predicated region body
PF: predicated region fallthrough
CT: control target
= control target key end

     0   :  { %12 = vsyncpa [#allocation3], 0  ;;  %s638_s0 = inlined_call_operand.hbm [shape: f32[8,32], index: 0, kind: input, shape index: {}]   ;;  %s639_s1 = inlined_call_operand.hbm [shape: bf16[32,50], index: 1, kind: input, shape index: {}]   ;;  %s640_s2 = inlined_call_operand.vmem [shape: f32[1,50], index: 2, kind: input, shape index: {}]   ;;  %s641_s3 = inlined_call_operand.hbm [shape: bf16[50,50], index: 3, kind: input, shape index: {}]   ;;  %s642_s4 = inlined_call_operand.vmem [shape: f32[1,50], index: 4, kind: input, shape index: {}]   ;;  %s643_s5 = inlined_call_operand.hbm [shape: bf16[50,128], index: 5, kind: input, shape index: {}]   ;;  %s644_s6 = inlined_call_operand.vmem [shape: f32[1,128], index: 6, kind: input, shape index: {}]   ;;  %s645_s7 = inlined_call_operand.vmem [shape: f32[8,128], index: 7, kind: output, shape index: {}]  }
   0x1   :  { %13 = vsyncpa [#allocation5], 0 }
   0x2   :  { %14 = vsyncpa [#allocation8], 0  ;;  %s514_s24 = smov [#allocation4]   ;;  %s420_s28 = scalar_lea.hbm %s639_s1, 256 }
   0x3   :  { %s30_s25 = sshll.u32 %s514_s24, 4  ;;  %p421_p0 = scmp.ne.s32.totalorder %s639_s1, %s420_s28  ;;  %s31_s25 = int_to_ptr.vmem [resolvable:$true] %s30_s25 }
   0x4   :  { %p424_p1 = scmp.lt.u32.totalorder %s420_s28, %s639_s1 }
   0x6   :  { %p426_p2 = pnand %p424_p1, %p421_p0 }
   0x8   :  { %429 = shalt.err (!%p426_p2)
}
   0x9   :  { %s430_s10 = scalar_lea.vmem %s31_s25, 256  ;;  %p435_p4 = scmp.lt.s32.totalorder %s31_s25, %s31_s25 }
   0xa   :  { %p431_p3 = scmp.ne.s32.totalorder %s31_s25, %s430_s10  ;;  %p436_p5 = scmp.lt.s32.totalorder %s430_s10, %s430_s10 }
   0xc   :  { %p437_p6 = por %p436_p5, %p435_p4 }
   0xe   :  { %p438_p7 = pnand %p437_p6, %p431_p3 }
  0x10   :  { %441 = shalt.err (!%p438_p7)
}
  0x11   :  { %s515_s11 = smov 64   ;;  %s516_s12 = smov 4  }
  0x12   :  { %36 = dma.hbm_to_vmem [thread:$0]  %s639_s1, 256, %s31_s25, [#allocation5], %s515_s11, %s515_s11, %s516_s12  }
  0x13   :  { %s517_s15 = smov [#allocation2]   ;;  %s518_s17 = smov [#allocation6]  }
  0x14   :  { %s21_s16 = sshll.u32 %s517_s15, 4  ;;  %s44_s18 = sshll.u32 %s518_s17, 4  ;;  %s22_s16 = int_to_ptr.vmem [resolvable:$true] %s21_s16  ;;  %s45_s18 = int_to_ptr.vmem [resolvable:$true] %s44_s18 }
  0x15   :  { %s442_s21 = scalar_lea.hbm %s638_s0, 128 }
  0x16   :  { %p443_p8 = scmp.ne.s32.totalorder %s638_s0, %s442_s21  ;;  %p446_p9 = scmp.lt.u32.totalorder %s442_s21, %s638_s0 }
  0x18   :  { %p448_p10 = pnand %p446_p9, %p443_p8 }
  0x1a   :  { %451 = shalt.err (!%p448_p10)
}
  0x1b   :  { %s452_s1 = scalar_lea.vmem %s22_s16, 128  ;;  %p457_p12 = scmp.lt.s32.totalorder %s22_s16, %s22_s16 }
  0x1c   :  { %p453_p11 = scmp.ne.s32.totalorder %s22_s16, %s452_s1  ;;  %p458_p13 = scmp.lt.s32.totalorder %s452_s1, %s452_s1 }
  0x1e   :  { %p459_p0 = por %p458_p13, %p457_p12 }
  0x20   :  { %p460_p1 = pnand %p459_p0, %p453_p11 }
  0x22   :  { %463 = shalt.err (!%p460_p1)
}
  0x23   :  { %24 = dma.hbm_to_vmem [thread:$0]  %s638_s0, 128, %s22_s16, [#allocation3]  }
  0x24   :  { %s464_s30 = scalar_lea.hbm %s641_s3, 448 }
  0x25   :  { %p465_p2 = scmp.ne.s32.totalorder %s641_s3, %s464_s30  ;;  %p468_p3 = scmp.lt.u32.totalorder %s464_s30, %s641_s3 }
  0x27   :  { %p470_p4 = pnand %p468_p3, %p465_p2 }
  0x29   :  { %473 = shalt.err (!%p470_p4)
}
  0x2a   :  { %s474_s14 = scalar_lea.vmem %s45_s18, 448  ;;  %p479_p6 = scmp.lt.s32.totalorder %s45_s18, %s45_s18 }
  0x2b   :  { %p475_p5 = scmp.ne.s32.totalorder %s45_s18, %s474_s14  ;;  %p480_p7 = scmp.lt.s32.totalorder %s474_s14, %s474_s14 }
  0x2d   :  { %p481_p8 = por %p480_p7, %p479_p6 }
  0x2f   :  { %p482_p9 = pnand %p481_p8, %p475_p5 }
  0x31   :  { %485 = shalt.err (!%p482_p9)
}
  0x32   :  { %50 = dma.hbm_to_vmem [thread:$0]  %s641_s3, 448, %s45_s18, [#allocation5], %s515_s11, %s515_s11, %s516_s12  }
  0x33   :  { %s519_s16 = smov [#allocation7]   ;;  %s486_s21 = scalar_lea.hbm %s643_s5, 448 }
  0x34   :  { %s58_s17 = sshll.u32 %s519_s16, 4  ;;  %p487_p10 = scmp.ne.s32.totalorder %s643_s5, %s486_s21  ;;  %s59_s17 = int_to_ptr.vmem [resolvable:$true] %s58_s17 }
  0x35   :  { %p490_p11 = scmp.lt.u32.totalorder %s486_s21, %s643_s5 }
  0x37   :  { %p492_p12 = pnand %p490_p11, %p487_p10 }
  0x39   :  { %495 = shalt.err (!%p492_p12)
}
  0x3a   :  { %s496_s1 = scalar_lea.vmem %s59_s17, 448  ;;  %p501_p0 = scmp.lt.s32.totalorder %s59_s17, %s59_s17 }
  0x3b   :  { %p497_p13 = scmp.ne.s32.totalorder %s59_s17, %s496_s1  ;;  %p502_p1 = scmp.lt.s32.totalorder %s496_s1, %s496_s1 }
  0x3d   :  { %p503_p2 = por %p502_p1, %p501_p0 }
  0x3f   :  { %p504_p3 = pnand %p503_p2, %p497_p13 }
  0x41   :  { %507 = shalt.err (!%p504_p3)
}
  0x42   :  { %64 = dma.hbm_to_vmem [thread:$0]  %s643_s5, 448, %s59_s17, [#allocation8], %s515_s11, %s515_s11, %s516_s12  }
  0x43   :  { %508 = dma.done.wait [#allocation3], 128  }
  0x44   :  { %509 = vsyncadd [#allocation3], 4294967168 }
  0x45   :  { %510 = dma.done.wait [#allocation5], 704  }
  0x46   :  { %511 = vsyncadd [#allocation5], 4294966592 }
  0x47   :  { %512 = dma.done.wait [#allocation8], 448  }
  0x48   :  { %513 = vsyncadd [#allocation8], 4294966848  ;;  %v520_v0 = vmov 0.0   ;;  %vm521_vm0 = vmmov 0   ;;  %v406_v1 = vld [vmem:[#allocation4] sm:$0xff]   ;;  %v407_v2 = vld [vmem:[#allocation4 + $0x8] sm:$0xff]  }
  0x49   :  { %366 = vmatprep.subr.bf16.mxu0 %v520_v0  ;;  %370 = vmatprep.mubr.msk.bf16.mxu0 %vm521_vm0, %v520_v0  ;;  %v80_v3 = vld [vmem:[#allocation2] sm:$0xff]  ;;  %v408_v4 = vld [vmem:[#allocation6] sm:$0xff]   ;;  %vm105_vm1 = vcmask 261120   ;;  %v410_v7 = vld [vmem:[#allocation6 + $0x10] sm:$0xff]   ;;  %vm190_vm2 = vcmask 1040384   ;;  %vm186_vm3 = vcmask 408576  }
  0x4a   :  { %374 = vmatprep.subr.bf16.mxu1 %v520_v0  ;;  %382 = vmatprep.mubr.msk.bf16.mxu1 %vm521_vm0, %v520_v0  ;;  %v409_v5 = vld [vmem:[#allocation6 + $0x8] sm:$0xff]   ;;  %v81_v6 = vpack.c.bf16 %v80_v3, %v80_v3  ;;  %v411_v8 = vld [vmem:[#allocation6 + $0x18] ss:$0 sps:$4 sm:$0x11]   ;;  %v412_v10 = vld [vmem:[#allocation7] sm:$0xff]  }
  0x4b   :  { %367 = vmatpush3.bf16.msra.mxu0 %v406_v1  ;;  %375 = vmatpush3.bf16.msra.mxu1 %v408_v4  ;;  %v192_v9 = vsel %vm190_vm2, %v411_v8, 0  ;;  %v413_v11 = vld [vmem:[#allocation7 + $0x8] sm:$0xff]   ;;  %v414_v20 = vld [vmem:[#allocation7 + $0x10] sm:$0xff]   ;;  %v415_v21 = vld [vmem:[#allocation7 + $0x18] ss:$0 sps:$4 sm:$0x11]  }
  0x4c   :  { %368 = vmatprep.subr.bf16.mxu0 %v520_v0  ;;  %376 = vmatprep.subr.bf16.mxu1 %v520_v0  ;;  %v337_v12 = vld [vmem:[%s640_s2] ss:$0 sm:$0xff]  ;;  %v275_v22 = vsel %vm190_vm2, %v415_v21, 0 }
  0x4d   :  { %v341_v23 = vld [vmem:[%s642_s4] ss:$0 sm:$0xff] }
  0x4e   :  { %v347_v31 = vld [vmem:[%s644_s6] ss:$0 sm:$0xff] }
  0x4f   :  { %369 = vmatpush3.bf16.msra.mxu0 %v407_v2  ;;  %377 = vmatpush3.bf16.msra.mxu1 %v409_v5 }
  0x50   :  { %386 = vmatprep.subr.bf16.mxu0 %v520_v0  ;;  %378 = vmatprep.subr.bf16.mxu1 %v520_v0 }
  0x52   :  { %371 = vmatmul.mubr.msk.bf16.vlgmr.msra.gmra.mrb[0].mxu0 %vm105_vm1, %v81_v6 }
  0x53   :  { %394 = vmatprep.mubr.msk.bf16.mxu0 %vm521_vm0, %v520_v0  ;;  %379 = vmatpush3.bf16.msra.mxu1 %v410_v7 }
  0x54   :  { %380 = vmatprep.subr.bf16.mxu1 %v520_v0  ;;  %387 = vmatpush3.bf16.msra.mxu0 %v412_v10 }
  0x55   :  { %388 = vmatprep.subr.bf16.mxu0 %v520_v0 }
  0x57   :  { %381 = vmatpush3.bf16.msra.mxu1 %v192_v9 }
  0x58   :  { %389 = vmatpush3.bf16.msra.mxu0 %v413_v11 }
  0x59   :  { %390 = vmatprep.subr.bf16.mxu0 %v520_v0 }
  0x5c   :  { %391 = vmatpush3.bf16.msra.mxu0 %v414_v20 }
  0x5d   :  { %392 = vmatprep.subr.bf16.mxu0 %v520_v0 }
  0x60   :  { %393 = vmatpush3.bf16.msra.mxu0 %v275_v22 }
 0x125   :  { %v143_v13 = vpop.f32.mrb[0].mxu0 }
 0x126   :  { %v144_v14 = vadd.f32 %v337_v12, %v143_v13  ;;  %v372_v15 = vpop.f32.mrb[1].mxu0 }
 0x127   :  { %v146_v16 = vpop.f32.mrb[2].mxu0 }
 0x128   :  { %v149_v17 = vmax.f32 %v144_v14, 0.0  ;;  %v373_v18 = vpop.f32.mrb[3].mxu0 }
 0x12a   :  { %v150_v19 = vpack.c.bf16 %v149_v17, %v149_v17 }
 0x12c   :  { %383 = vmatmul.mubr.msk.bf16.vlgmr.msra.gmra.mrb[0].mxu1 %vm186_vm3, %v150_v19 }
 0x1ff   :  { %v228_v24 = vpop.f32.mrb[0].mxu1 }
 0x200   :  { %v229_v25 = vadd.f32 %v341_v23, %v228_v24  ;;  %v384_v26 = vpop.f32.mrb[1].mxu1 }
 0x201   :  { %v231_v27 = vpop.f32.mrb[2].mxu1 }
 0x202   :  { %v234_v28 = vmax.f32 %v229_v25, 0.0  ;;  %v385_v29 = vpop.f32.mrb[3].mxu1 }
 0x204   :  { %v235_v30 = vpack.c.bf16 %v234_v28, %v234_v28 }
 0x206   :  { %395 = vmatmul.mubr.msk.bf16.vlgmr.msra.gmra.mrb[4].mxu0 %vm186_vm3, %v235_v30 }
 0x2d9   :  { %v311_v32 = vpop.f32.mrb[4].mxu0 }
 0x2da   :  { %v312_v33 = vadd.f32 %v347_v31, %v311_v32  ;;  %v396_v34 = vpop.f32.mrb[5].mxu0 }
 0x2db   :  { %v314_v35 = vpop.f32.mrb[6].mxu0 }
 0x2dc   :  { %317 = vmax.xlane.f32.xlu0 %v312_v33  ;;  %v397_v36 = vpop.f32.mrb[7].mxu0 }
 0x369   :  { %v318_v37 = vpop.xlane.xlu0 %317 }
 0x36a   :  { %v319_v38 = vsub.f32 %v312_v33, %v318_v37 }
 0x36c   :  { %v320_v39 = vmul.f32 1.442695, %v319_v38 }
 0x36e   :  { %416 = vpow2.f32 %v320_v39 }
 0x378   :  { %v417_v40 = vpop.eup %416 }
 0x379   :  { %322 = vadd.xlane.f32.xlu0 %v417_v40 }
 0x406   :  { %v323_v41 = vpop.xlane.xlu0 %322 }
 0x407   :  { %418 = vrcp.f32 %v323_v41 }
 0x411   :  { %v419_v42 = vpop.eup %418 }
 0x412   :  { %v325_v43 = vmul.f32 %v419_v42, %v323_v41 }
 0x414   :  { %v326_v44 = vsub.f32 2.0, %v325_v43 }
 0x416   :  { %v327_v45 = vmul.f32 %v419_v42, %v326_v44 }
 0x418   :  { %v328_v46 = vmul.f32 %v417_v40, %v327_v45 }
 0x41a   :  { %329 = vst [vmem:[%s645_s7] sm:$0xff] %v328_v46 }
 0x41b   :  { %334 = vsyncpa [#allocation3], 1 }
 0x41c   :  { %335 = vsyncpa [#allocation5], 1 }
 0x41d   :  { %336 = vsyncpa [#allocation8], 1 }

</bundles_post_ra>
